<compile_context>
chip_gen: v7x
topology: tpu7x:2x2x1
jax: 0.10.0
libtpu: 0.0.40
codegen_flags: <defaults>
</compile_context>

<pallas_src>
import functools

import jax
import jax.numpy as jnp
from jax import lax
from jax.experimental import pallas as pl
from jax.experimental.pallas import tpu as pltpu


# Conservative VMEM targets so the same sizing works on v5e/v6e (128 MiB) and
# v7x (64 MiB per TensorCore).
_VMEM_WORKSET_BYTES = 32 * 1024 * 1024
_VMEM_LIMIT_BYTES = 48 * 1024 * 1024


def _round_up(x, m):
    return ((x + m - 1) // m) * m


def _choose_tile_n(n, c, itemsize, workset_bytes=_VMEM_WORKSET_BYTES):
    """Largest multiple-of-8 row tile whose full working set fits the budget.

    Working set per row = double-buffered input tile (input dtype) plus ~2 live
    f32 (T, C) intermediates (f32 view of the tile + exp slab), all counted at
    the physical lane-padded width.
    """
    c_lanes = _round_up(c, 128)                    # physical lane footprint
    per_row = c_lanes * (2 * itemsize + 2 * 4)
    max_rows = max(8, workset_bytes // per_row)
    tile = min(max_rows, _round_up(n, 8))
    return max(8, (tile // 8) * 8)


def _angle_loss_kernel(col_ref, cos_ref, out_ref, *, n_valid, rows_padded):
    """One batch tile: correction-form logsumexp of the margin-blended row.

    col_ref: (T, 2) f32 in VMEM   -- col 0: cos_theta[i, target[i]]
                                     col 1: blended target logit z_t
    cos_ref: (T, C) in VMEM       -- cos_theta rows (full class dim, unpadded)
    out_ref: (1, 8, 128) f32      -- lane-dense partial-sum slab
    """
    x = cos_ref[...]                                   # (T, C), input dtype
    cols = col_ref[...]                                # (T, 2) f32
    cos_t = cols[:, 0:1]                               # (T, 1)
    z_t = cols[:, 1:2]                                 # (T, 1)

    # Row max in the native dtype (bf16-capable VPU on v6e/v7x), then include
    # the blended target logit so every exponent below is <= 0.
    m_row = jnp.max(x, axis=-1, keepdims=True).astype(jnp.float32)     # (T, 1)
    m = jnp.maximum(m_row, z_t)                                        # (T, 1)

    # The margin blend only changes the target column (cos_t -> z_t), so the
    # logsumexp of the blended row is a rank-1 correction of the plain row:
    #   sumexp(output) = sumexp(cos) - exp(cos_t - m) + exp(z_t - m)
    # (exp(cos_t - m) is itself a term of the sum, so the subtraction is safe.)
    s = jnp.sum(jnp.exp(x.astype(jnp.float32) - m), axis=-1, keepdims=True)
    s = s - jnp.exp(cos_t - m) + jnp.exp(z_t - m)
    logpt = z_t - m - jnp.log(s)                                       # (T, 1)

    if rows_padded:
        t = logpt.shape[0]
        row = pl.program_id(0) * t + lax.broadcasted_iota(jnp.int32, (t, 1), 0)
        logpt = jnp.where(row < n_valid, logpt, 0.0)   # kill garbage OOB rows

    partial = -jnp.sum(logpt)
    out_ref[...] = jnp.broadcast_to(partial, out_ref.shape).astype(jnp.float32)


def angle_loss(cos_theta, phi_theta, target, *, it=1, test=False, mode="mean",
               tile_n=None):
    """Pallas implementation of AngleLoss.forward.

    cos_theta, phi_theta: (N, C) float arrays (f32 or bf16)
    target:               (N,)   int class indices
    it:   iteration counter (PyTorch increments before use; first call -> 1).
          May be a traced value; it only feeds runtime scalar math.
    test: if True, output[index] = phi_theta[index]  (== coef = 1.0)
    mode: 'mean' or anything-else == sum (matching the PyTorch module)
    """
    n, c = cos_theta.shape
    lambda_min, lambda_max = 0.1, 1500.0

    # coef and the per-row blend are runtime values computed on tiny (N, 1)
    # columns in the wrapper -> no recompile as `it` changes, and the second
    # full (N, C) stream (phi_theta) never touches the kernel.
    if test:
        coef = jnp.float32(1.0)
    else:
        it_f = jnp.asarray(it, jnp.float32)
        lamb = jnp.maximum(jnp.float32(lambda_min),
                           jnp.float32(lambda_max) / (1.0 + 0.2 * it_f))
        coef = 1.0 / (1.0 + lamb)

    tgt2d = target.reshape(n, 1).astype(jnp.int32)
    cos_t = jnp.take_along_axis(cos_theta, tgt2d, axis=1).astype(jnp.float32)
    phi_t = jnp.take_along_axis(phi_theta, tgt2d, axis=1).astype(jnp.float32)
    z_t = cos_t + (phi_t - cos_t) * coef          # blended target logit
    cols = jnp.concatenate([cos_t, z_t], axis=1)  # (N, 2) f32

    itemsize = jnp.dtype(cos_theta.dtype).itemsize
    if tile_n is None:
        tile_n = _choose_tile_n(n, c, itemsize)
    else:
        tile_n = max(8, (int(tile_n) // 8) * 8)
    num_tiles = pl.cdiv(n, tile_n)

    kernel = functools.partial(
        _angle_loss_kernel,
        n_valid=n,
        rows_padded=(n % tile_n != 0),
    )

    partials = pl.pallas_call(
        kernel,
        out_shape=jax.ShapeDtypeStruct((num_tiles, 8, 128), jnp.float32),
        grid=(num_tiles,),
        in_specs=[
            pl.BlockSpec((tile_n, 2), lambda i: (i, 0)),   # [cos_t, z_t]
            pl.BlockSpec((tile_n, c), lambda i: (i, 0)),   # cos_theta (full C)
        ],
        out_specs=pl.BlockSpec((1, 8, 128), lambda i: (i, 0, 0)),
        compiler_params=pltpu.CompilerParams(
            dimension_semantics=("parallel",),
            vmem_limit_bytes=_VMEM_LIMIT_BYTES),
    )(cols, cos_theta)

    loss = jnp.sum(partials[:, 0, 0])
    if mode == "mean":
        loss = loss / jnp.float32(n)
    return loss


def _angle_loss_ref(cos_theta, phi_theta, target, *, it=1, test=False, mode="mean"):
    """Pure-JAX reference mirroring the PyTorch forward (f32 math)."""
    cos_theta = cos_theta.astype(jnp.float32)
    phi_theta = phi_theta.astype(jnp.float32)
    n, c = cos_theta.shape
    one_hot = jax.nn.one_hot(target, c, dtype=jnp.bool_)
    if test:
        output = jnp.where(one_hot, phi_theta, cos_theta)
    else:
        lamb = max(0.1, 1500.0 / (1.0 + 0.2 * float(it)))
        coef = 1.0 / (1.0 + lamb)
        output = jnp.where(one_hot,
                           cos_theta - cos_theta * coef + phi_theta * coef,
                           cos_theta)
    logp = jax.nn.log_softmax(output, axis=-1)
    logpt = jnp.sum(jnp.where(one_hot, logp, 0.0), axis=-1)
    loss = -logpt
    return loss.mean() if mode == "mean" else loss.sum()


if __name__ == "__main__":
    key = jax.random.PRNGKey(0)
    k1, k2, k3 = jax.random.split(key, 3)

    # Case 1: small batch / small class count (block spans the full C=16 axis).
    N, C = 8, 16
    cos_theta = jax.random.uniform(k1, (N, C), jnp.float32, minval=-1.0, maxval=1.0)
    phi_theta = cos_theta - jax.random.uniform(k2, (N, C), jnp.float32,
                                               minval=0.0, maxval=0.5)
    target = jax.random.randint(k3, (N,), 0, C, dtype=jnp.int32)

    loss = jax.block_until_ready(
        angle_loss(cos_theta, phi_theta, target, it=1, mode="mean"))
    ref = _angle_loss_ref(cos_theta, phi_theta, target, it=1, mode="mean")
    assert jnp.allclose(loss, ref, atol=1e-5, rtol=1e-5), (loss, ref)

    # test=True branch (hard replace at the target column).
    loss_t = jax.block_until_ready(
        angle_loss(cos_theta, phi_theta, target, test=True, mode="mean"))
    ref_t = _angle_loss_ref(cos_theta, phi_theta, target, test=True, mode="mean")
    assert jnp.allclose(loss_t, ref_t, atol=1e-5, rtol=1e-5), (loss_t, ref_t)

    # Case 2: multiple batch tiles + ragged last tile (40 % 16 != 0), 'sum'
    # mode, later iteration count.
    k4, k5, k6 = jax.random.split(k3, 3)
    N2, C2 = 40, 40
    cos2 = jax.random.uniform(k4, (N2, C2), jnp.float32, minval=-1.0, maxval=1.0)
    phi2 = cos2 - jax.random.uniform(k5, (N2, C2), jnp.float32,
                                     minval=0.0, maxval=0.5)
    tgt2 = jax.random.randint(k6, (N2,), 0, C2, dtype=jnp.int32)
    loss2 = jax.block_until_ready(
        angle_loss(cos2, phi2, tgt2, it=3, mode="sum", tile_n=16))
    ref2 = _angle_loss_ref(cos2, phi2, tgt2, it=3, mode="sum")
    assert jnp.allclose(loss2, ref2, atol=1e-4, rtol=1e-5), (loss2, ref2)

    # Case 3: bf16 inputs — rowmax runs in bf16, logsumexp accumulates in f32.
    cos3 = cos2.astype(jnp.bfloat16)
    phi3 = phi2.astype(jnp.bfloat16)
    loss3 = jax.block_until_ready(
        angle_loss(cos3, phi3, tgt2, it=3, mode="mean"))
    ref3 = _angle_loss_ref(cos3, phi3, tgt2, it=3, mode="mean")
    assert jnp.allclose(loss3, ref3, atol=1e-3, rtol=1e-3), (loss3, ref3)

    print("KERNEL_OK")
</pallas_src>

<mosaic_0001>
module attributes {stable_mosaic.version = 11 : i64} {
  func.func @_angle_loss_kernel(%arg0: i32, %arg1: memref<8x2xf32, #tpu.memory_space<vmem>>, %arg2: memref<8x16xf32, #tpu.memory_space<vmem>>, %arg3: memref<1x8x128xf32, #tpu.memory_space<vmem>>) attributes {dimension_semantics = [#tpu.dimension_semantics<parallel>], iteration_bounds = array<i64: 1>, scalar_prefetch = 0 : i64, scratch_operands = 0 : i64, tpu.core_type = #tpu.core_type<tc>, window_params = [{transform_indices = @transform_0, window_bounds = array<i64: 8, 2>}, {transform_indices = @transform_1, window_bounds = array<i64: 8, 16>}, {transform_indices = @transform_2, window_bounds = array<i64: 1, 8, 128>}]} {
    %c0 = arith.constant 0 : index
    %c0_0 = arith.constant 0 : index
    %0 = vector.load %arg2[%c0, %c0_0] : memref<8x16xf32, #tpu.memory_space<vmem>>, vector<8x16xf32>
    %c0_1 = arith.constant 0 : index
    %c0_2 = arith.constant 0 : index
    %1 = vector.load %arg1[%c0_1, %c0_2] : memref<8x2xf32, #tpu.memory_space<vmem>>, vector<8x2xf32>
    %2 = vector.extract_strided_slice %1 {offsets = [0, 0], sizes = [8, 1], strides = [1, 1]} : vector<8x2xf32> to vector<8x1xf32>
    %3 = vector.extract_strided_slice %1 {offsets = [0, 1], sizes = [8, 1], strides = [1, 1]} : vector<8x2xf32> to vector<8x1xf32>
    %cst = arith.constant dense<0xFF800000> : vector<8xf32>
    %4 = vector.multi_reduction <maximumf>, %0, %cst [1] : vector<8x16xf32> to vector<8xf32>
    %5 = vector.shape_cast %4 : vector<8xf32> to vector<8x1xf32>
    %6 = arith.maximumf %5, %3 : vector<8x1xf32>
    %7 = vector.broadcast %6 : vector<8x1xf32> to vector<8x16xf32>
    %8 = arith.subf %0, %7 : vector<8x16xf32>
    %9 = math.exp %8 : vector<8x16xf32>
    %cst_3 = arith.constant dense<0.000000e+00> : vector<8xf32>
    %10 = vector.multi_reduction <add>, %9, %cst_3 [1] : vector<8x16xf32> to vector<8xf32>
    %11 = vector.shape_cast %10 : vector<8xf32> to vector<8x1xf32>
    %12 = arith.subf %2, %6 : vector<8x1xf32>
    %13 = math.exp %12 : vector<8x1xf32>
    %14 = arith.subf %11, %13 : vector<8x1xf32>
    %15 = arith.subf %3, %6 : vector<8x1xf32>
    %16 = math.exp %15 : vector<8x1xf32>
    %17 = arith.addf %14, %16 : vector<8x1xf32>
    %18 = arith.subf %3, %6 : vector<8x1xf32>
    %19 = math.log %17 : vector<8x1xf32>
    %20 = arith.subf %18, %19 : vector<8x1xf32>
    %21 = vector.shape_cast %20 : vector<8x1xf32> to vector<1x8x1xf32>
    %cst_4 = arith.constant dense<0.000000e+00> : vector<1xf32>
    %22 = vector.multi_reduction <add>, %21, %cst_4 [1, 2] : vector<1x8x1xf32> to vector<1xf32>
    %23 = vector.shape_cast %22 : vector<1xf32> to vector<1x1x1xf32>
    %24 = vector.extract %23[0, 0, 0] : f32 from vector<1x1x1xf32>
    %cst_5 = arith.constant 0.000000e+00 : f32
    %25 = arith.subf %cst_5, %24 : f32
    %26 = vector.broadcast %25 : f32 to vector<1x8x128xf32>
    %c0_6 = arith.constant 0 : index
    %c0_7 = arith.constant 0 : index
    %c0_8 = arith.constant 0 : index
    %27 = vector.load %arg3[%c0_6, %c0_7, %c0_8] : memref<1x8x128xf32, #tpu.memory_space<vmem>>, vector<1x8x128xf32>
    tpu.vector_store %arg3[%c0_6, %c0_7, %c0_8], %26 {strides = array<i32>} : memref<1x8x128xf32, #tpu.memory_space<vmem>>, vector<1x8x128xf32>,
    return
  }
  func.func @transform_0(%arg0: i32) -> (i32, i32) {
    %c0_i32 = arith.constant 0 : i32
    %c0_i32_0 = arith.constant 0 : i32
    return %arg0, %c0_i32 : i32, i32
  }
  func.func @transform_1(%arg0: i32) -> (i32, i32) {
    %c0_i32 = arith.constant 0 : i32
    %c0_i32_0 = arith.constant 0 : i32
    return %arg0, %c0_i32 : i32, i32
  }
  func.func @transform_2(%arg0: i32) -> (i32, i32, i32) {
    %c0_i32 = arith.constant 0 : i32
    %c0_i32_0 = arith.constant 0 : i32
    %c0_i32_1 = arith.constant 0 : i32
    return %arg0, %c0_i32, %c0_i32_0 : i32, i32, i32
  }
}

</mosaic_0001>

<bundles_post_ra>
// kernel: tpu_custom_call.1
= control target key start
LH: loop header
LB: loop body
LE: loop exit
PB: predicated region body
PF: predicated region fallthrough
CT: control target
= control target key end

     0   :  { %vm14_vm0 = vcmask 130048   ;;  %s165_s0 = inlined_call_operand.vmem [shape: f32[8,2], index: 0, kind: input, shape index: {}]   ;;  %s166_s1 = inlined_call_operand.vmem [shape: f32[8,16], index: 1, kind: input, shape index: {}]   ;;  %s167_s2 = inlined_call_operand.hbm [shape: f32[1,8,128], index: 2, kind: output, shape index: {}]  }
   0x1   :  { %v12_v0 = vld [vmem:[%s166_s1] sm:$0xff] }
   0x2   :  { %7 = vsyncpa [#allocation3], 0  ;;  %v15_v1 = vsel %vm14_vm0, %v12_v0, -inf  ;;  %v123_v2 = vmov 1   ;;  %v13_v3 = vld [vmem:[%s165_s0] sm:$0xff]  ;;  %s124_s13 = smov 127  }
   0x3   :  { %16 = vmax.xlane.f32.xlu0 %v15_v1  ;;  %s125_s0 = smov 1   ;;  %vm56_vm1 = vcmask 7168   ;;  %s126_s1 = smov [#allocation2]  }
   0x4   :  { %90 = vset.pattern.permute.xlu0 %v123_v2  ;;  %s76_s14 = sshll.u32 %s126_s1, 4  ;;  %s77_s14 = int_to_ptr.vmem [resolvable:$true] %s76_s14 }
   0x5   :  { %s99_s17 = scalar_lea.vmem %s77_s14, 128  ;;  %p104_p1 = scmp.lt.s32.totalorder %s77_s14, %s77_s14 }
   0x6   :  { %p100_p0 = scmp.ne.s32.totalorder %s77_s14, %s99_s17  ;;  %p105_p2 = scmp.lt.s32.totalorder %s99_s17, %s99_s17 }
   0x8   :  { %p106_p3 = por %p105_p2, %p104_p1 }
   0xa   :  { %p107_p4 = pnand %p106_p3, %p100_p0 }
  0x90   :  { %v17_v4 = vpop.xlane.xlu0 %16 }
  0x91   :  { %v18_v5 = vmax.f32 %v17_v4, %v13_v3 }
  0x93   :  { %30 = vrot.lane.b32.xlu1 %v18_v5, %s124_s13  ;;  %21 = vperm.xlu0 %90, %v18_v5   ;;  %v37_v10 = vsub.f32 %v13_v3, %v18_v5 }
  0x95   :  { %v38_v12 = vmul.f32 1.442695, %v37_v10 }
 0x105   :  { %v31_v14 = vpop.permute.xlu1 %30 }
 0x106   :  { %v33_v15 = vsub.f32 %v13_v3, %v31_v14 }
 0x108   :  { %v34_v16 = vmul.f32 1.442695, %v33_v15 }
 0x112   :  { %v22_v6 = vpop.permute.xlu0 %21 }
 0x113   :  { %v24_v7 = vsub.f32 %v12_v0, %v22_v6 }
 0x115   :  { %v25_v8 = vmul.f32 1.442695, %v24_v7 }
 0x117   :  { %91 = vpow2.f32 %v25_v8 }
 0x118   :  { %93 = vpow2.f32 %v38_v12 }
 0x119   :  { %95 = vpow2.f32 %v34_v16 }
 0x121   :  { %v92_v9 = vpop.eup %91 }
 0x122   :  { %v27_v11 = vsel %vm14_vm0, %v92_v9, 0.0  ;;  %v94_v13 = vpop.eup %93 }
 0x123   :  { %28 = vadd.xlane.f32.xlu1 %v27_v11  ;;  %v96_v18 = vpop.eup %95 }
 0x134   :  { %41 = vrot.lane.b32.xlu1 %v94_v13, %s124_s13 }
 0x1b0   :  { %v29_v17 = vpop.xlane.xlu1 %28 }
 0x1b1   :  { %v36_v19 = vsub.f32 %v29_v17, %v96_v18 }
 0x1b4   :  { %v42_v20 = vpop.permute.xlu1 %41 }
 0x1b5   :  { %v44_v21 = vadd.f32 %v42_v20, %v36_v19 }
 0x1b7   :  { %97 = vlog2.f32 %v44_v21 }
 0x1c1   :  { %v98_v22 = vpop.eup %97 }
 0x1c2   :  { %v46_v23 = vmul.f32 0.6931472, %v98_v22 }
 0x1c4   :  { %48 = vrot.lane.b32.xlu0 %v46_v23, %s125_s0 }
 0x236   :  { %v49_v24 = vpop.permute.xlu0 %48 }
 0x237   :  { %v51_v25 = vsub.f32 %v37_v10, %v49_v24 }
 0x239   :  { %53 = vrot.lane.b32.xlu0 %v51_v25, %s124_s13 }
 0x2ab   :  { %v54_v26 = vpop.permute.xlu0 %53 }
 0x2ac   :  { %v57_v27 = vsel %vm56_vm1, %v54_v26, 0.0 }
 0x2ad   :  { %58 = vadd.xlane.f32.xlu0 %v57_v27 }
 0x33a   :  { %v59_v28 = vpop.xlane.xlu0 %58 }
 0x33b   :  { %v60_v29 = vrot.slane %v59_v28, 4 }
 0x33d   :  { %v61_v30 = vadd.f32 %v60_v29, %v59_v28 }
 0x33f   :  { %v62_v31 = vrot.slane %v61_v30, 2 }
 0x341   :  { %v63_v32 = vadd.f32 %v62_v31, %v61_v30 }
 0x343   :  { %v64_v33 = vrot.slane %v63_v32, 1 }
 0x345   :  { %v65_v34 = vadd.f32 %v64_v33, %v63_v32 }
 0x347   :  { %84 = vpush %v65_v34 }
 0x378   :  { %s85_s15 = spop %84 }
 0x379   :  { %s67_s16 = ssub.f32 0.0, %s85_s15 }
 0x37b   :  { %v68_v35 = vstv %s67_s16 }
 0x37c   :  { %69 = vst [vmem:[#allocation2] sm:$0xff] %v68_v35 }
 0x37d   :  { %110 = shalt.err (!%p107_p4)
}
 0x37e   :  { %s111_s20 = scalar_lea.hbm %s167_s2, 128 }
 0x37f   :  { %p112_p5 = scmp.ne.s32.totalorder %s167_s2, %s111_s20  ;;  %p115_p6 = scmp.lt.u32.totalorder %s111_s20, %s167_s2 }
 0x381   :  { %p117_p7 = pnand %p115_p6, %p112_p5 }
 0x383   :  { %120 = shalt.err (!%p117_p7)
}
 0x384   :  { %79 = dma.vmem_to_hbm [thread:$0]  %s77_s14, 128, %s167_s2, [#allocation3]  }
 0x385   :  { %121 = dma.done.wait [#allocation3], 128  }
 0x386   :  { %122 = vsyncadd [#allocation3], 4294967168 }
 0x387   :  { %83 = vsyncpa [#allocation3], 1 }

</bundles_post_ra>
